<compile_context>
chip_gen: v7x
topology: tpu7x:2x2x1
jax: 0.10.0
libtpu: 0.0.40
codegen_flags: <defaults>
</compile_context>

<pallas_src>
import functools

import jax
import jax.numpy as jnp
from jax.experimental import pallas as pl
from jax.experimental.pallas import tpu as pltpu


# ----------------------------- Fused Pallas kernel --------------------------

def gcn_pairnorm_fused_kernel(x_ref, a_ref, w_ref, b_ref, o_ref, *, num_layers):
    """BatchNorm1d -> [GConv -> PairNorm -> (ReLU)] x num_layers for ONE graph.

    x_ref : (1, N, Fpad)       f32   padded input features for this graph
    a_ref : (1, L, N, N)       f32   stacked row-normalized adjacencies (this graph)
    w_ref : (L, Fpad, Fpad)    bf16  stacked zero-padded weights (shared, resident)
    b_ref : (L, 1, Fpad)       f32   stacked zero-padded biases  (shared, resident)
    o_ref : (1, N, Fpad)       f32   padded output (lane-dense store)
    """
    x = x_ref[0]                                                   # f32 (N, Fpad)

    # --- BatchNorm1d(affine=False), training mode: batch stats, biased var ---
    mean = jnp.mean(x, axis=0, keepdims=True)                      # (1, Fpad)
    xc = x - mean
    var = jnp.mean(xc * xc, axis=0, keepdims=True)                 # biased variance
    h = xc * jax.lax.rsqrt(var + 1e-5)                             # f32 (N, Fpad)

    # --- layers (static unroll; L is small and known at trace time) ---------
    for i in range(num_layers):
        a = a_ref[0, i]                                            # f32  (N, N)
        w = w_ref[i]                                               # bf16 (Fpad, Fpad)
        b = b_ref[i]                                               # f32  (1, Fpad)

        # GConv: A @ (H @ W) + b
        #   H @ W  : bf16 MXU operands, f32 accumulation (Fpad contraction)
        #   A @ HW : kept f32 — contraction depth is only N, cost negligible.
        hw = jnp.dot(h.astype(jnp.bfloat16), w,
                     preferred_element_type=jnp.float32)           # (N, Fpad)
        z = jnp.dot(a, hw, preferred_element_type=jnp.float32) + b # (N, Fpad)

        # PairNorm (mode='PN', scale=1) — all math in f32.
        col_mean = jnp.mean(z, axis=0, keepdims=True)              # (1, Fpad)
        zc = z - col_mean
        row_sq = jnp.sum(zc * zc, axis=1, keepdims=True)           # (N, 1)
        mean_row_sq = jnp.mean(row_sq, axis=0, keepdims=True)      # (1, 1)
        h = zc * jax.lax.rsqrt(mean_row_sq + 1e-6)

        if i < num_layers - 1:
            h = jnp.maximum(h, 0.0)                                # ReLU

    o_ref[0] = h.astype(o_ref.dtype)


# ----------------------------- Wrapper ---------------------------------------

F_PAD = 128   # lane-dense feature width (all dims here are <= 128)


def _pad_last(arr, target):
    pad = target - arr.shape[-1]
    if pad == 0:
        return arr
    cfg = [(0, 0)] * (arr.ndim - 1) + [(0, pad)]
    return jnp.pad(arr, cfg)


def gcn_pairnorm_forward(nodeblocks_batched, x_batched, weights, biases):
    """Batched forward pass of GCN_Pairnorm over B independent graphs.

    nodeblocks_batched : (B, L, N, N) f32  per-graph, per-layer adjacencies
    x_batched          : (B, N, F)    f32  per-graph node features
    weights / biases   : shared per-layer parameters (lists of length L)
    Returns (B, N, num_classes).
    """
    num_layers = len(weights)
    B, N, _ = x_batched.shape
    num_classes = weights[-1].shape[1]
    L = num_layers

    # Zero-pad everything to a 128-lane feature slab; pads stay exactly zero
    # through BN, matmuls, bias, PairNorm and ReLU, and are sliced off at the end.
    # TODO(synk): if hidden dims ever exceed 128, pad each layer's K/N
    # independently to the next multiple of 128 instead of one global F_PAD.
    x_pad = _pad_last(x_batched, F_PAD).astype(jnp.float32)               # (B, N, 128)
    w_stack = jnp.stack([
        _pad_last(jnp.pad(w, ((0, F_PAD - w.shape[0]), (0, 0))), F_PAD)
        for w in weights]).astype(jnp.bfloat16)                           # (L, 128, 128)
    b_stack = jnp.stack([_pad_last(b, F_PAD) for b in biases]
                        ).astype(jnp.float32)                             # (L, 1, 128)
    a_stack = nodeblocks_batched.astype(jnp.float32)                      # (B, L, N, N)

    kernel = functools.partial(gcn_pairnorm_fused_kernel, num_layers=num_layers)

    out_pad = pl.pallas_call(
        kernel,
        out_shape=jax.ShapeDtypeStruct((B, N, F_PAD), jnp.float32),
        grid=(B,),
        in_specs=[
            # per-graph blocks: pipelined across the grid
            pl.BlockSpec((1, N, F_PAD), lambda g: (g, 0, 0)),
            pl.BlockSpec((1, L, N, N), lambda g: (g, 0, 0, 0)),
            # shared parameters: constant block index -> fetched once, resident
            pl.BlockSpec((L, F_PAD, F_PAD), lambda g: (0, 0, 0)),
            pl.BlockSpec((L, 1, F_PAD), lambda g: (0, 0, 0)),
        ],
        out_specs=pl.BlockSpec((1, N, F_PAD), lambda g: (g, 0, 0)),
        compiler_params=pltpu.CompilerParams(
            # independent graphs -> parallel (uses both TCs on v7x; free on v5e/v6e)
            dimension_semantics=("parallel",),
            # explicit budget with headroom vs v7x's 64 MiB physical VMEM
            vmem_limit_bytes=32 * 1024 * 1024,
        ),
    )(x_pad, a_stack, w_stack, b_stack)

    return out_pad[:, :, :num_classes]


# ----------------------------- Pure-JAX reference ----------------------------

def reference_forward_single(nodeblocks, x, weights, biases):
    mean = x.mean(axis=0)
    var = ((x - mean) ** 2).mean(axis=0)
    h = (x - mean) / jnp.sqrt(var + 1e-5)
    for i, (a, w, b) in enumerate(zip(nodeblocks, weights, biases)):
        h = a @ (h @ w) + b
        h = h - h.mean(axis=0)
        rn = jnp.sqrt(1e-6 + (h ** 2).sum(axis=1).mean())
        h = h / rn
        if i < len(weights) - 1:
            h = jnp.maximum(h, 0.0)
    return h


# ----------------------------- Main -------------------------------------------

if __name__ == "__main__":
    key = jax.random.PRNGKey(0)

    # Small, module-consistent shapes; B independent graphs per pallas_call.
    B = 8                  # number of graphs batched into one kernel launch
    N = 32                 # number of nodes in each nodeblock
    features_dim = 16
    hidden_dim = 32
    num_classes = 8
    num_layers = 3

    dims = [features_dim] + [hidden_dim] * (num_layers - 1) + [num_classes]

    # Shared deterministic parameters (Glorot-ish scale).
    weights, biases = [], []
    for li in range(num_layers):
        key, kw = jax.random.split(key)
        f_in, f_out = dims[li], dims[li + 1]
        w = jax.random.normal(kw, (f_in, f_out), jnp.float32) * (1.0 / jnp.sqrt(f_in))
        b = jnp.zeros((1, f_out), jnp.float32)
        weights.append(w)
        biases.append(b)

    # Per-graph row-normalized adjacencies (symmetric + self-loops) and features.
    nb_list, x_list = [], []
    for g in range(B):
        adjs = []
        for li in range(num_layers):
            key, ka = jax.random.split(key)
            adj = (jax.random.uniform(ka, (N, N)) < 0.2).astype(jnp.float32)
            adj = adj + adj.T + jnp.eye(N, dtype=jnp.float32)
            adj = adj / jnp.sum(adj, axis=1, keepdims=True)
            adjs.append(adj)
        nb_list.append(jnp.stack(adjs))                 # (L, N, N)
        key, kx = jax.random.split(key)
        x_list.append(jax.random.normal(kx, (N, features_dim), jnp.float32))

    nodeblocks_batched = jnp.stack(nb_list)             # (B, L, N, N)
    x_batched = jnp.stack(x_list)                       # (B, N, F)

    out = gcn_pairnorm_forward(nodeblocks_batched, x_batched, weights, biases)
    out = jax.block_until_ready(out)

    ref = jnp.stack([
        reference_forward_single(
            [nodeblocks_batched[g, li] for li in range(num_layers)],
            x_batched[g], weights, biases)
        for g in range(B)])

    assert out.shape == (B, N, num_classes)
    # H@W uses bf16 MXU operands (f32 accumulate) -> relaxed tolerance vs f32 ref.
    rel = jnp.linalg.norm(out - ref) / jnp.linalg.norm(ref)
    assert jnp.allclose(out, ref, atol=3e-2, rtol=3e-2), "mismatch vs JAX reference"
    assert rel < 3e-2, f"relative error too large: {rel}"

    print("KERNEL_OK")
</pallas_src>

<mosaic_0001>
module attributes {stable_mosaic.version = 11 : i64} {
  func.func @gcn_pairnorm_fused_kernel(%arg0: i32, %arg1: memref<1x32x128xf32, #tpu.memory_space<vmem>>, %arg2: memref<1x3x32x32xf32, #tpu.memory_space<vmem>>, %arg3: memref<3x128x128xbf16, #tpu.memory_space<vmem>>, %arg4: memref<3x1x128xf32, #tpu.memory_space<vmem>>, %arg5: memref<1x32x128xf32, #tpu.memory_space<vmem>>) attributes {dimension_semantics = [#tpu.dimension_semantics<parallel>], iteration_bounds = array<i64: 8>, scalar_prefetch = 0 : i64, scratch_operands = 0 : i64, tpu.core_type = #tpu.core_type<tc>, window_params = [{transform_indices = @transform_0, window_bounds = array<i64: 1, 32, 128>}, {transform_indices = @transform_1, window_bounds = array<i64: 1, 3, 32, 32>}, {pipeline_mode = #tpu.pipeline_mode<synchronous>, transform_indices = @transform_2, window_bounds = array<i64: 3, 128, 128>}, {pipeline_mode = #tpu.pipeline_mode<synchronous>, transform_indices = @transform_3, window_bounds = array<i64: 3, 1, 128>}, {transform_indices = @transform_4, window_bounds = array<i64: 1, 32, 128>}]} {
    %c0 = arith.constant 0 : index
    %c0_0 = arith.constant 0 : index
    %c0_1 = arith.constant 0 : index
    %0 = vector.load %arg1[%c0, %c0_0, %c0_1] : memref<1x32x128xf32, #tpu.memory_space<vmem>>, vector<1x32x128xf32>
    %1 = vector.shape_cast %0 : vector<1x32x128xf32> to vector<32x128xf32>
    %cst = arith.constant dense<0.000000e+00> : vector<128xf32>
    %2 = vector.multi_reduction <add>, %1, %cst [0] : vector<32x128xf32> to vector<128xf32>
    %3 = vector.shape_cast %2 : vector<128xf32> to vector<1x128xf32>
    %cst_2 = arith.constant 3.200000e+01 : f32
    %4 = vector.broadcast %cst_2 : f32 to vector<1x128xf32>
    %5 = arith.divf %3, %4 : vector<1x128xf32>
    %6 = vector.broadcast %5 : vector<1x128xf32> to vector<32x128xf32>
    %7 = arith.subf %1, %6 : vector<32x128xf32>
    %8 = arith.mulf %7, %7 : vector<32x128xf32>
    %cst_3 = arith.constant dense<0.000000e+00> : vector<128xf32>
    %9 = vector.multi_reduction <add>, %8, %cst_3 [0] : vector<32x128xf32> to vector<128xf32>
    %10 = vector.shape_cast %9 : vector<128xf32> to vector<1x128xf32>
    %cst_4 = arith.constant 3.200000e+01 : f32
    %11 = vector.broadcast %cst_4 : f32 to vector<1x128xf32>
    %12 = arith.divf %10, %11 : vector<1x128xf32>
    %cst_5 = arith.constant 9.99999974E-6 : f32
    %13 = vector.broadcast %cst_5 : f32 to vector<1x128xf32>
    %14 = arith.addf %12, %13 : vector<1x128xf32>
    %15 = math.rsqrt %14 : vector<1x128xf32>
    %16 = vector.broadcast %15 : vector<1x128xf32> to vector<32x128xf32>
    %17 = arith.mulf %7, %16 : vector<32x128xf32>
    %c0_6 = arith.constant 0 : index
    %c0_7 = arith.constant 0 : index
    %c0_8 = arith.constant 0 : index
    %c0_9 = arith.constant 0 : index
    %18 = vector.load %arg2[%c0_6, %c0_7, %c0_8, %c0_9] : memref<1x3x32x32xf32, #tpu.memory_space<vmem>>, vector<1x1x32x32xf32>
    %19 = vector.shape_cast %18 : vector<1x1x32x32xf32> to vector<32x32xf32>
    %c0_10 = arith.constant 0 : index
    %c0_11 = arith.constant 0 : index
    %c0_12 = arith.constant 0 : index
    %20 = vector.load %arg3[%c0_10, %c0_11, %c0_12] : memref<3x128x128xbf16, #tpu.memory_space<vmem>>, vector<1x128x128xbf16>
    %21 = vector.shape_cast %20 : vector<1x128x128xbf16> to vector<128x128xbf16>
    %c0_13 = arith.constant 0 : index
    %c0_14 = arith.constant 0 : index
    %c0_15 = arith.constant 0 : index
    %22 = vector.load %arg4[%c0_13, %c0_14, %c0_15] : memref<3x1x128xf32, #tpu.memory_space<vmem>>, vector<1x1x128xf32>
    %23 = vector.shape_cast %22 : vector<1x1x128xf32> to vector<1x128xf32>
    %24 = arith.truncf %17 : vector<32x128xf32> to vector<32x128xbf16>
    %cst_16 = arith.constant dense<0.000000e+00> : vector<32x128xf32>
    %25 = tpu.matmul %24, %21, %cst_16 {dimension_numbers = #tpu.dot_dimension_numbers<[1], [0], [0], [1], [0, 0, 1, 1], [], []>} : vector<32x128xbf16>, vector<128x128xbf16>, vector<32x128xf32> -> vector<32x128xf32>
    %cst_17 = arith.constant dense<0.000000e+00> : vector<32x128xf32>
    %26 = tpu.matmul %19, %25, %cst_17 {dimension_numbers = #tpu.dot_dimension_numbers<[1], [0], [0], [1], [0, 0, 1, 1], [], []>} : vector<32x32xf32>, vector<32x128xf32>, vector<32x128xf32> -> vector<32x128xf32>
    %27 = vector.broadcast %23 : vector<1x128xf32> to vector<32x128xf32>
    %28 = arith.addf %26, %27 : vector<32x128xf32>
    %cst_18 = arith.constant dense<0.000000e+00> : vector<128xf32>
    %29 = vector.multi_reduction <add>, %28, %cst_18 [0] : vector<32x128xf32> to vector<128xf32>
    %30 = vector.shape_cast %29 : vector<128xf32> to vector<1x128xf32>
    %cst_19 = arith.constant 3.200000e+01 : f32
    %31 = vector.broadcast %cst_19 : f32 to vector<1x128xf32>
    %32 = arith.divf %30, %31 : vector<1x128xf32>
    %33 = vector.broadcast %32 : vector<1x128xf32> to vector<32x128xf32>
    %34 = arith.subf %28, %33 : vector<32x128xf32>
    %35 = arith.mulf %34, %34 : vector<32x128xf32>
    %cst_20 = arith.constant dense<0.000000e+00> : vector<32xf32>
    %36 = vector.multi_reduction <add>, %35, %cst_20 [1] : vector<32x128xf32> to vector<32xf32>
    %37 = vector.shape_cast %36 : vector<32xf32> to vector<32x1xf32>
    %cst_21 = arith.constant dense<0.000000e+00> : vector<1xf32>
    %38 = vector.multi_reduction <add>, %37, %cst_21 [0] : vector<32x1xf32> to vector<1xf32>
    %39 = vector.shape_cast %38 : vector<1xf32> to vector<1x1xf32>
    %cst_22 = arith.constant 3.200000e+01 : f32
    %40 = vector.broadcast %cst_22 : f32 to vector<1x1xf32>
    %41 = arith.divf %39, %40 : vector<1x1xf32>
    %cst_23 = arith.constant 9.99999997E-7 : f32
    %42 = vector.broadcast %cst_23 : f32 to vector<1x1xf32>
    %43 = arith.addf %41, %42 : vector<1x1xf32>
    %44 = math.rsqrt %43 : vector<1x1xf32>
    %45 = vector.broadcast %44 : vector<1x1xf32> to vector<32x128xf32>
    %46 = arith.mulf %34, %45 : vector<32x128xf32>
    %cst_24 = arith.constant 0.000000e+00 : f32
    %47 = vector.broadcast %cst_24 : f32 to vector<32x128xf32>
    %48 = arith.maximumf %46, %47 : vector<32x128xf32>
    %c0_25 = arith.constant 0 : index
    %c1 = arith.constant 1 : index
    %c0_26 = arith.constant 0 : index
    %c0_27 = arith.constant 0 : index
    %49 = vector.load %arg2[%c0_25, %c1, %c0_26, %c0_27] : memref<1x3x32x32xf32, #tpu.memory_space<vmem>>, vector<1x1x32x32xf32>
    %50 = vector.shape_cast %49 : vector<1x1x32x32xf32> to vector<32x32xf32>
    %c1_28 = arith.constant 1 : index
    %c0_29 = arith.constant 0 : index
    %c0_30 = arith.constant 0 : index
    %51 = vector.load %arg3[%c1_28, %c0_29, %c0_30] : memref<3x128x128xbf16, #tpu.memory_space<vmem>>, vector<1x128x128xbf16>
    %52 = vector.shape_cast %51 : vector<1x128x128xbf16> to vector<128x128xbf16>
    %c1_31 = arith.constant 1 : index
    %c0_32 = arith.constant 0 : index
    %c0_33 = arith.constant 0 : index
    %53 = vector.load %arg4[%c1_31, %c0_32, %c0_33] : memref<3x1x128xf32, #tpu.memory_space<vmem>>, vector<1x1x128xf32>
    %54 = vector.shape_cast %53 : vector<1x1x128xf32> to vector<1x128xf32>
    %55 = arith.truncf %48 : vector<32x128xf32> to vector<32x128xbf16>
    %cst_34 = arith.constant dense<0.000000e+00> : vector<32x128xf32>
    %56 = tpu.matmul %55, %52, %cst_34 {dimension_numbers = #tpu.dot_dimension_numbers<[1], [0], [0], [1], [0, 0, 1, 1], [], []>} : vector<32x128xbf16>, vector<128x128xbf16>, vector<32x128xf32> -> vector<32x128xf32>
    %cst_35 = arith.constant dense<0.000000e+00> : vector<32x128xf32>
    %57 = tpu.matmul %50, %56, %cst_35 {dimension_numbers = #tpu.dot_dimension_numbers<[1], [0], [0], [1], [0, 0, 1, 1], [], []>} : vector<32x32xf32>, vector<32x128xf32>, vector<32x128xf32> -> vector<32x128xf32>
    %58 = vector.broadcast %54 : vector<1x128xf32> to vector<32x128xf32>
    %59 = arith.addf %57, %58 : vector<32x128xf32>
    %cst_36 = arith.constant dense<0.000000e+00> : vector<128xf32>
    %60 = vector.multi_reduction <add>, %59, %cst_36 [0] : vector<32x128xf32> to vector<128xf32>
    %61 = vector.shape_cast %60 : vector<128xf32> to vector<1x128xf32>
    %cst_37 = arith.constant 3.200000e+01 : f32
    %62 = vector.broadcast %cst_37 : f32 to vector<1x128xf32>
    %63 = arith.divf %61, %62 : vector<1x128xf32>
    %64 = vector.broadcast %63 : vector<1x128xf32> to vector<32x128xf32>
    %65 = arith.subf %59, %64 : vector<32x128xf32>
    %66 = arith.mulf %65, %65 : vector<32x128xf32>
    %cst_38 = arith.constant dense<0.000000e+00> : vector<32xf32>
    %67 = vector.multi_reduction <add>, %66, %cst_38 [1] : vector<32x128xf32> to vector<32xf32>
    %68 = vector.shape_cast %67 : vector<32xf32> to vector<32x1xf32>
    %cst_39 = arith.constant dense<0.000000e+00> : vector<1xf32>
    %69 = vector.multi_reduction <add>, %68, %cst_39 [0] : vector<32x1xf32> to vector<1xf32>
    %70 = vector.shape_cast %69 : vector<1xf32> to vector<1x1xf32>
    %cst_40 = arith.constant 3.200000e+01 : f32
    %71 = vector.broadcast %cst_40 : f32 to vector<1x1xf32>
    %72 = arith.divf %70, %71 : vector<1x1xf32>
    %cst_41 = arith.constant 9.99999997E-7 : f32
    %73 = vector.broadcast %cst_41 : f32 to vector<1x1xf32>
    %74 = arith.addf %72, %73 : vector<1x1xf32>
    %75 = math.rsqrt %74 : vector<1x1xf32>
    %76 = vector.broadcast %75 : vector<1x1xf32> to vector<32x128xf32>
    %77 = arith.mulf %65, %76 : vector<32x128xf32>
    %cst_42 = arith.constant 0.000000e+00 : f32
    %78 = vector.broadcast %cst_42 : f32 to vector<32x128xf32>
    %79 = arith.maximumf %77, %78 : vector<32x128xf32>
    %c0_43 = arith.constant 0 : index
    %c2 = arith.constant 2 : index
    %c0_44 = arith.constant 0 : index
    %c0_45 = arith.constant 0 : index
    %80 = vector.load %arg2[%c0_43, %c2, %c0_44, %c0_45] : memref<1x3x32x32xf32, #tpu.memory_space<vmem>>, vector<1x1x32x32xf32>
    %81 = vector.shape_cast %80 : vector<1x1x32x32xf32> to vector<32x32xf32>
    %c2_46 = arith.constant 2 : index
    %c0_47 = arith.constant 0 : index
    %c0_48 = arith.constant 0 : index
    %82 = vector.load %arg3[%c2_46, %c0_47, %c0_48] : memref<3x128x128xbf16, #tpu.memory_space<vmem>>, vector<1x128x128xbf16>
    %83 = vector.shape_cast %82 : vector<1x128x128xbf16> to vector<128x128xbf16>
    %c2_49 = arith.constant 2 : index
    %c0_50 = arith.constant 0 : index
    %c0_51 = arith.constant 0 : index
    %84 = vector.load %arg4[%c2_49, %c0_50, %c0_51] : memref<3x1x128xf32, #tpu.memory_space<vmem>>, vector<1x1x128xf32>
    %85 = vector.shape_cast %84 : vector<1x1x128xf32> to vector<1x128xf32>
    %86 = arith.truncf %79 : vector<32x128xf32> to vector<32x128xbf16>
    %cst_52 = arith.constant dense<0.000000e+00> : vector<32x128xf32>
    %87 = tpu.matmul %86, %83, %cst_52 {dimension_numbers = #tpu.dot_dimension_numbers<[1], [0], [0], [1], [0, 0, 1, 1], [], []>} : vector<32x128xbf16>, vector<128x128xbf16>, vector<32x128xf32> -> vector<32x128xf32>
    %cst_53 = arith.constant dense<0.000000e+00> : vector<32x128xf32>
    %88 = tpu.matmul %81, %87, %cst_53 {dimension_numbers = #tpu.dot_dimension_numbers<[1], [0], [0], [1], [0, 0, 1, 1], [], []>} : vector<32x32xf32>, vector<32x128xf32>, vector<32x128xf32> -> vector<32x128xf32>
    %89 = vector.broadcast %85 : vector<1x128xf32> to vector<32x128xf32>
    %90 = arith.addf %88, %89 : vector<32x128xf32>
    %cst_54 = arith.constant dense<0.000000e+00> : vector<128xf32>
    %91 = vector.multi_reduction <add>, %90, %cst_54 [0] : vector<32x128xf32> to vector<128xf32>
    %92 = vector.shape_cast %91 : vector<128xf32> to vector<1x128xf32>
    %cst_55 = arith.constant 3.200000e+01 : f32
    %93 = vector.broadcast %cst_55 : f32 to vector<1x128xf32>
    %94 = arith.divf %92, %93 : vector<1x128xf32>
    %95 = vector.broadcast %94 : vector<1x128xf32> to vector<32x128xf32>
    %96 = arith.subf %90, %95 : vector<32x128xf32>
    %97 = arith.mulf %96, %96 : vector<32x128xf32>
    %cst_56 = arith.constant dense<0.000000e+00> : vector<32xf32>
    %98 = vector.multi_reduction <add>, %97, %cst_56 [1] : vector<32x128xf32> to vector<32xf32>
    %99 = vector.shape_cast %98 : vector<32xf32> to vector<32x1xf32>
    %cst_57 = arith.constant dense<0.000000e+00> : vector<1xf32>
    %100 = vector.multi_reduction <add>, %99, %cst_57 [0] : vector<32x1xf32> to vector<1xf32>
    %101 = vector.shape_cast %100 : vector<1xf32> to vector<1x1xf32>
    %cst_58 = arith.constant 3.200000e+01 : f32
    %102 = vector.broadcast %cst_58 : f32 to vector<1x1xf32>
    %103 = arith.divf %101, %102 : vector<1x1xf32>
    %cst_59 = arith.constant 9.99999997E-7 : f32
    %104 = vector.broadcast %cst_59 : f32 to vector<1x1xf32>
    %105 = arith.addf %103, %104 : vector<1x1xf32>
    %106 = math.rsqrt %105 : vector<1x1xf32>
    %107 = vector.broadcast %106 : vector<1x1xf32> to vector<32x128xf32>
    %108 = arith.mulf %96, %107 : vector<32x128xf32>
    %c0_60 = arith.constant 0 : index
    %c0_61 = arith.constant 0 : index
    %c0_62 = arith.constant 0 : index
    %109 = vector.load %arg5[%c0_60, %c0_61, %c0_62] : memref<1x32x128xf32, #tpu.memory_space<vmem>>, vector<1x32x128xf32>
    %110 = vector.shape_cast %109 : vector<1x32x128xf32> to vector<32x128xf32>
    %111 = vector.shape_cast %108 : vector<32x128xf32> to vector<1x32x128xf32>
    tpu.vector_store %arg5[%c0_60, %c0_61, %c0_62], %111 {strides = array<i32>} : memref<1x32x128xf32, #tpu.memory_space<vmem>>, vector<1x32x128xf32>,
    return
  }
  func.func @transform_0(%arg0: i32) -> (i32, i32, i32) {
    %c0_i32 = arith.constant 0 : i32
    %c0_i32_0 = arith.constant 0 : i32
    %c0_i32_1 = arith.constant 0 : i32
    return %arg0, %c0_i32, %c0_i32_0 : i32, i32, i32
  }
  func.func @transform_1(%arg0: i32) -> (i32, i32, i32, i32) {
    %c0_i32 = arith.constant 0 : i32
    %c0_i32_0 = arith.constant 0 : i32
    %c0_i32_1 = arith.constant 0 : i32
    %c0_i32_2 = arith.constant 0 : i32
    return %arg0, %c0_i32, %c0_i32_0, %c0_i32_1 : i32, i32, i32, i32
  }
  func.func @transform_2(%arg0: i32) -> (i32, i32, i32) {
    %c0_i32 = arith.constant 0 : i32
    %c0_i32_0 = arith.constant 0 : i32
    %c0_i32_1 = arith.constant 0 : i32
    %c0_i32_2 = arith.constant 0 : i32
    return %c0_i32, %c0_i32_0, %c0_i32_1 : i32, i32, i32
  }
  func.func @transform_3(%arg0: i32) -> (i32, i32, i32) {
    %c0_i32 = arith.constant 0 : i32
    %c0_i32_0 = arith.constant 0 : i32
    %c0_i32_1 = arith.constant 0 : i32
    %c0_i32_2 = arith.constant 0 : i32
    return %c0_i32, %c0_i32_0, %c0_i32_1 : i32, i32, i32
  }
  func.func @transform_4(%arg0: i32) -> (i32, i32, i32) {
    %c0_i32 = arith.constant 0 : i32
    %c0_i32_0 = arith.constant 0 : i32
    %c0_i32_1 = arith.constant 0 : i32
    return %arg0, %c0_i32, %c0_i32_0 : i32, i32, i32
  }
}

</mosaic_0001>

<bundles_post_ra>
// kernel: tpu_custom_call.1
= control target key start
LH: loop header
LB: loop body
LE: loop exit
PB: predicated region body
PF: predicated region fallthrough
CT: control target
= control target key end

     0   :  { %s2075_s0 = inlined_call_operand.hbm [shape: f32[8,32,128], index: 0, kind: input, shape index: {}]   ;;  %s2076_s1 = inlined_call_operand.hbm [shape: f32[8,3,32,32], index: 1, kind: input, shape index: {}]   ;;  %s2077_s2 = inlined_call_operand.hbm [shape: bf16[3,128,128], index: 2, kind: input, shape index: {}]   ;;  %s2078_s3 = inlined_call_operand.vmem [shape: f32[3,1,128], index: 3, kind: input, shape index: {}]   ;;  %s2079_s4 = inlined_call_operand.hbm [shape: f32[8,32,128], index: 4, kind: output, shape index: {}]  }
   0x1   :  { %2083 = sst [smem:[#allocation13_spill]] %s2075_s0 }
   0x2   :  { %2084 = sst [smem:[#allocation14_spill]] %s2077_s2 }
   0x3   :  { %9 = vsyncpa [#allocation3], 0 }
   0x4   :  { %11 = vsyncpa [#allocation3 + $0x1], 0 }
   0x5   :  { %12 = vsyncpa [#allocation6], 0 }
   0x6   :  { %14 = vsyncpa [#allocation6 + $0x1], 0 }
   0x7   :  { %15 = vsyncpa [#allocation4], 0 }
   0x8   :  { %17 = vsyncpa [#allocation4 + $0x1], 0  ;;  %s1793_s15 = smov 0   ;;  %s1795_s16 = smov 0  }
   0x9   :  { %s1797_s17 = smov 0   ;;  %s1799_s18 = smov 0  }
   0xa LB: > { %s1814_s19 = sadd.s32 4294967295, %s1756_s18   ;;  %s1243_s20 = sadd.s32 4294967294, %s1756_s18   ;;  %s1756_s18 = sphi %s1799_s18, %s2102_s18   ;;  %s1752_s17 = sphi %s1797_s17, %s2101_s17   ;;  %s1748_s16 = sphi %s1795_s16, %s2100_s16   ;;  %s1744_s15 = sphi %s1793_s15, %s2099_s15  }
   0xb   : > { %p43_p0 = scmp.ne.s32.totalorder %s1748_s16, %s1744_s15  ;;  %p2080_p1 = scmp.eq.s32.totalorder %s1814_s19, 0 }
   0xc   : > { %p141_p3 = scmp.eq.s32.totalorder %s1243_s20, 7  ;;  %p1244_p5 = scmp.ge.s32.totalorder %s1756_s18, 1 }
   0xd   : > { %p1823_p4 = por %p2080_p1, %p43_p0  ;;  %p148_p7 = scmp.lt.s32.totalorder %s1756_s18, 9 }
   0xe   : > { %p1828_p6 = por %p141_p3, %p43_p0  ;;  %s1758_s24 = smov [#allocation7]  }
   0xf   : > { %s2085_s21 = scalar_select %p1823_p4, 1, 0 }
  0x10   : > { %s2086_s22 = scalar_select %p1828_p6, 1, 0 }
  0x11   : > { %p1833_p8 = pnand %p1244_p5, %p148_p7  ;;  %s160_s25 = sshll.u32 %s1758_s24, 4  ;;  %s161_s25 = int_to_ptr.vmem [resolvable:$true] %s160_s25 }
  0x12   : > { %s1846_s27 = sadd.s32 1, %s1756_s18   ;;  %s30_s28 = sadd.s32 1, %s1752_s17 }
  0x13   : > { %s2087_s23 = scalar_select %p1833_p8, 1, 0 }
  0x14   : > { %p1504_p9 = pneg %p1833_p8  ;;  %s27_s29 = ssub.s32 %s1756_s18, %s1846_s27 }
  0x15   : > { %s2089_s2 = sld [smem:[#allocation14_spill]] }
  0x16   : > { %p1841_p10 = pnand %p1504_p9, %p2080_p1 }
  0x18   : > { %p1596_p12 = pneg %p1841_p10 }
  0x1b   : > { %s1594_s6 = scalar_lea.hbm %s2089_s2, 3072 }
  0x1c   : > { %p1595_p11 = scmp.ne.s32.totalorder %s2089_s2, %s1594_s6  ;;  %p1601_p3 = scmp.lt.u32.totalorder %s1594_s6, %s2089_s2 }
  0x1e   : > { %p1597_p13 = pnand %p1596_p12, %p1595_p11 }
  0x20   : > { %p1598_p0 = pneg %p1597_p13 }
  0x22   : > { %p1603_p5 = pnand %p1601_p3, %p1598_p0 }
  0x24   : > { %1606 = shalt.err (!%p1603_p5)
}
  0x25   : > { %s1607_s11 = scalar_lea.vmem %s161_s25, 3072  ;;  %p1615_p2 = scmp.lt.s32.totalorder %s161_s25, %s161_s25 }
  0x26   : > { %p1608_p7 = scmp.ne.s32.totalorder %s161_s25, %s1607_s11  ;;  %p1616_p6 = scmp.lt.s32.totalorder %s1607_s11, %s1607_s11 }
  0x28   : > { %p1610_p9 = pnand %p1608_p7, %p1596_p12  ;;  %p1617_p4 = por %p1616_p6, %p1615_p2 }
  0x2a   : > { %p1611_p1 = pneg %p1610_p9 }
  0x2c   : > { %p1618_p8 = pnand %p1617_p4, %p1611_p1 }
  0x2e   : > { %1621 = shalt.err (!%p1618_p8)
}
  0x2f   : > { %s1759_s12 = smov 64   ;;  %s1760_s13 = smov 4  }
  0x30   : > { %1507 = dma.hbm_to_vmem [thread:$0]  (!%p1841_p10), %s2089_s2, 3072, %s161_s25, [#allocation6], %s1759_s12, %s1759_s12, %s1760_s13  }
  0x31   : > { %p28_p11 = scmp.eq.s32.totalorder %s27_s29, 0  ;;  %p37_p2 = scmp.ne.s32.totalorder %s1752_s17, %s1748_s16 }
  0x32   : > { %p38_p1 = scmp.eq.s32.totalorder %s1756_s18, 0  ;;  %p1520_p4 = scmp.lt.s32.totalorder %s1756_s18, 8 }
  0x33   : > { %s1872_s24 = scalar_select %p28_p11, %s1752_s17, %s30_s28  }
  0x34   : > { %p39_p6 = por %p38_p1, %p37_p2  ;;  %p2090_p8 = scmp.eq.s32.totalorder %s1814_s19, 7 }
  0x35   : > { %s1881_s5 = sand.u32 1, %s1752_s17   ;;  %s1309_s26 = sshll.u32 %s1756_s18, 9 }
  0x36   : > { %p1876_p12 = por %p2090_p8, %p37_p2  ;;  %s1247_s6 = sshll.u32 %s1881_s5, 5 }
  0x37   : > { %s2092_s0 = sld [smem:[#allocation13_spill]]  ;;  %s181_s28 = scalar_lea.vmem [#allocation2], %s1247_s6 }
  0x38   : > { %s188_s8 = sshll.u32 %s181_s28, 4  ;;  %p1890_p10 = pnand %p1520_p4, %p39_p6  ;;  %s1894_s8 = int_to_ptr.vmem [resolvable:$true] %s188_s8 }
  0x39   : > { %s178_s10 = scalar_lea.sflag [#allocation3], %s1881_s5 }
  0x3a   : > { %p1624_p0 = pneg %p1890_p10 }
  0x3d   : > { %s1888_s29 = scalar_lea.hbm %s2092_s0, %s1309_s26  ;;  %s1627_s14 = scalar_lea.hbm %s2092_s0, 4096 }
  0x3e   : > { %s1622_s11 = scalar_lea.hbm %s1888_s29, 512  ;;  %p1628_p7 = scmp.lt.u32.totalorder %s1888_s29, %s2092_s0 }
  0x3f   : > { %p1623_p13 = scmp.ne.s32.totalorder %s1888_s29, %s1622_s11  ;;  %p1629_p9 = scmp.lt.u32.totalorder %s1627_s14, %s1622_s11 }
  0x40   : > { %p1631_p2 = scmp.lt.u32.totalorder %s1622_s11, %s1888_s29 }
  0x41   : > { %p1625_p3 = pnand %p1624_p0, %p1623_p13  ;;  %p1630_p11 = por %p1629_p9, %p1628_p7 }
  0x43   : > { %p1626_p5 = pneg %p1625_p3  ;;  %p1632_p1 = por %p1631_p2, %p1630_p11 }
  0x45   : > { %p1633_p4 = pnand %p1632_p1, %p1626_p5 }
  0x47   : > { %1636 = shalt.err (!%p1633_p4)
}
  0x48   : > { %s1637_s6 = scalar_lea.vmem %s1894_s8, 512  ;;  %s1761_s7 = smov [#allocation2]  }
  0x49   : > { %p1638_p6 = scmp.ne.s32.totalorder %s1894_s8, %s1637_s6  ;;  %s1642_s25 = sshll.u32 %s1761_s7, 4  ;;  %s1643_s25 = int_to_ptr.vmem [resolvable:$false] %s1642_s25 }
  0x4a   : > { %s1644_s28 = scalar_lea.vmem %s1643_s25, 1024  ;;  %p1645_p3 = scmp.lt.s32.totalorder %s1894_s8, %s1643_s25 }
  0x4b   : > { %p1640_p8 = pnand %p1638_p6, %p1624_p0  ;;  %p1646_p7 = scmp.lt.s32.totalorder %s1644_s28, %s1637_s6 }
  0x4d   : > { %p1641_p13 = pneg %p1640_p8  ;;  %p1647_p9 = por %p1646_p7, %p1645_p3 }
  0x4f   : > { %p1648_p11 = pnand %p1647_p9, %p1641_p13 }
  0x51   : > { %1651 = shalt.err (!%p1648_p11)
}
  0x52   : > { %s1762_s11 = smov 128   ;;  %s1763_s12 = smov 8  }
  0x53   : > { %1511 = dma.hbm_to_vmem [thread:$0]  (!%p1890_p10), %s1888_s29, 512, %s1894_s8, %s178_s10, %s1762_s11, %s1762_s11, %s1763_s12  }
  0x54   : > { %s198_s13 = sand.u32 1, %s1756_s18   ;;  %s1491_s14 = smul.u32 96, %s1881_s5 }
  0x55   : > { %s1492_s20 = smul.u32 1536, %s1756_s18  ;;  %s1937_s0 = scalar_lea.sflag [#allocation6], %s198_s13 }
  0x56   : > { %s202_s25 = scalar_lea.vmem [#allocation5], %s1491_s14  ;;  %s1657_s8 = scalar_lea.hbm %s2076_s1, 12288 }
  0x57   : > { %s1933_s7 = scalar_lea.hbm %s2076_s1, %s1492_s20  ;;  %s209_s28 = sshll.u32 %s202_s25, 4  ;;  %s1935_s28 = int_to_ptr.vmem [resolvable:$true] %s209_s28 }
  0x58   : > { %s1652_s2 = scalar_lea.hbm %s1933_s7, 1536  ;;  %p1658_p4 = scmp.lt.u32.totalorder %s1933_s7, %s2076_s1 }
  0x59   : > { %p1653_p5 = scmp.ne.s32.totalorder %s1933_s7, %s1652_s2  ;;  %p1659_p6 = scmp.lt.u32.totalorder %s1657_s8, %s1652_s2 }
  0x5a   : > { %p1661_p13 = scmp.lt.u32.totalorder %s1652_s2, %s1933_s7 }
  0x5b   : > { %p1655_p2 = pnand %p1653_p5, %p1624_p0  ;;  %p1660_p8 = por %p1659_p6, %p1658_p4 }
  0x5d   : > { %p1656_p1 = pneg %p1655_p2  ;;  %p1662_p3 = por %p1661_p13, %p1660_p8 }
  0x5f   : > { %p1663_p7 = pnand %p1662_p3, %p1656_p1 }
  0x61   : > { %1666 = shalt.err (!%p1663_p7)
}
  0x62   : > { %s1667_s13 = scalar_lea.vmem %s1935_s28, 1536  ;;  %s1764_s14 = smov [#allocation5]  }
  0x63   : > { %p1668_p9 = scmp.ne.s32.totalorder %s1935_s28, %s1667_s13  ;;  %s1672_s26 = sshll.u32 %s1764_s14, 4  ;;  %s1673_s26 = int_to_ptr.vmem [resolvable:$false] %s1672_s26 }
  0x64   : > { %s1674_s6 = scalar_lea.vmem %s1673_s26, 3072  ;;  %p1675_p2 = scmp.lt.s32.totalorder %s1935_s28, %s1673_s26 }
  0x65   : > { %p1670_p11 = pnand %p1668_p9, %p1624_p0  ;;  %p1676_p4 = scmp.lt.s32.totalorder %s1674_s6, %s1667_s13 }
  0x67   : > { %p1671_p5 = pneg %p1670_p11  ;;  %p1677_p6 = por %p1676_p4, %p1675_p2 }
  0x69   : > { %p1678_p8 = pnand %p1677_p6, %p1671_p5 }
  0x6b   : > { %1681 = shalt.err (!%p1678_p8)
}
  0x6c   : > { %1514 = dma.hbm_to_vmem [thread:$0]  (!%p1890_p10), %s1933_s7, 1536, %s1935_s28, %s1937_s0, %s1762_s11, %s1762_s11, %s1763_s12  }
  0x6d   : > { %p2094_p0 = scmp.ne.s32.totalorder %s2087_s23, 0 }
  0x6e   : > { %s1969_s2 = sand.u32 (!%p2094_p0), 1, %s1748_s16   ;;  %p2095_p1 = scmp.ne.s32.totalorder (!%p2094_p0), %s2085_s21, 0 }
  0x6f   : > { %221 = sbr.rel (%p2094_p0) target bundleno = 2154 (0x86a), region = 36  ;;  %s1252_s25 = sshll.u32 (!%p2094_p0), %s1969_s2, 5 }
  0x70   : > { %s224_s5 = scalar_lea.sflag (!%p2094_p0), [#allocation3], %s1969_s2  ;;  %s227_s9 = scalar_lea.vmem (!%p2094_p0), [#allocation2], %s1252_s25 }
  0x76   : > { %1727 = dma.done.wait (%p2095_p1), %s224_s5, 512  }
  0x77   : > { %1729 = vsyncadd (%p2095_p1), %s224_s5, 4294966784  ;;  %s232_s0 = sand.u32 1, %s1814_s19   ;;  %s1493_s23 = smul.u32 96, %s1969_s2 }
  0x78   : > { %s233_s11 = scalar_lea.sflag [#allocation6], %s232_s0 }
  0x79   : > { %s1981_s12 = scalar_lea.vmem [#allocation5], %s1493_s23 }
  0x7a   : > { %1731 = dma.done.wait (%p2095_p1), %s233_s11, 1536  }
  0x7b   : > { %1733 = vsyncadd (%p2095_p1), %s233_s11, 4294965760  ;;  %p2096_p10 = scmp.eq.s32.totalorder %s1814_s19, 0 }
  0x7d   : > { %1735 = dma.done.wait (%p2096_p10), [#allocation6], 3072   ;;  %p2097_p13 = pmov %p2096_p10 }
  0x7e   : > { %v1562_v0 = vld [vmem:[#allocation7] sm:$0xff]   ;;  %v1563_v1 = vld [vmem:[#allocation7 + $0x8] sm:$0xff]   ;;  %v1564_v2 = vld [vmem:[#allocation7 + $0x10] sm:$0xff]   ;;  %vm436_vm0 = vcmask 261120   ;;  %s1310_s20 = sshll.u32 %s1814_s19, 9  ;;  %s269_s13 = scalar_lea.vmem [#allocation8], %s1252_s25 }
  0x7f   : > { %1737 = vsyncadd (%p2097_p13), [#allocation6], 4294964224  ;;  %1365 = vmatprep.subr.bf16.mxu0 %v1562_v0  ;;  %v1565_v3 = vld [vmem:[#allocation7 + $0x18] sm:$0xff]   ;;  %v271_v4 = vld [vmem:[%s227_s9] sm:$0xff]  ;;  %s1138_s14 = sshll.u32 %s269_s13, 4  ;;  %s2030_s5 = scalar_lea.hbm %s2079_s4, %s1310_s20  ;;  %s2032_s14 = int_to_ptr.vmem [resolvable:$true] %s1138_s14 }
  0x80   : > { %1366 = vmatpush3.bf16.msra.mxu0 %v1562_v0  ;;  %v272_v5 = vld [vmem:[%s227_s9 + $0x8] sm:$0xff]  ;;  %v273_v6 = vld [vmem:[%s227_s9 + $0x10] sm:$0xff]  ;;  %v274_v7 = vld [vmem:[%s227_s9 + $0x18] sm:$0xff]  ;;  %s1125_s19 = scalar_lea.sflag [#allocation4], %s1969_s2  ;;  %s1682_s25 = scalar_lea.vmem %s2032_s14, 512 }
  0x81   : > { %1367 = vmatprep.subr.bf16.mxu0 %v1563_v1  ;;  %v275_v8 = vadd.f32 %v272_v5, %v271_v4  ;;  %v1566_v9 = vld [vmem:[#allocation7 + $0x20] sm:$0xff]   ;;  %v1567_v12 = vld [vmem:[#allocation7 + $0x28] sm:$0xff]   ;;  %v1568_v16 = vld [vmem:[#allocation7 + $0x30] sm:$0xff]   ;;  %p1683_p3 = scmp.ne.s32.totalorder %s2032_s14, %s1682_s25  ;;  %s1765_s9 = smov [#allocation8]  }
  0x82   : > { %v1569_v19 = vld [vmem:[#allocation7 + $0x38] sm:$0xff]   ;;  %v310_v48 = vld [vmem:[%s1981_s12] sm:$0xff]  ;;  %v311_v55 = vld [vmem:[%s1981_s12 + $0x8] sm:$0xff]  ;;  %s1686_s0 = sshll.u32 %s1765_s9, 4  ;;  %s1687_s0 = int_to_ptr.vmem [resolvable:$false] %s1686_s0 }
  0x83   : > { %v276_v10 = vadd.f32 %v275_v8, %v273_v6  ;;  %1393 = vmatprep.mubr.msk.f32.mxu1 %vm436_vm0, %v310_v48  ;;  %v312_v56 = vld [vmem:[%s1981_s12 + $0x10] sm:$0xff]  ;;  %v313_v57 = vld [vmem:[%s1981_s12 + $0x18] sm:$0xff]  ;;  %v1263_v58 = vld [vmem:[%s2078_s3] ss:$0 sm:$0xff]  ;;  %p1684_p7 = pnand %p1683_p3, %p1876_p12  ;;  %s1688_s23 = scalar_lea.vmem %s1687_s0, 1024 }
  0x84   : > { %1368 = vmatpush3.bf16.msra.mxu0 %v1563_v1  ;;  %p1689_p11 = scmp.lt.s32.totalorder %s2032_s14, %s1687_s0  ;;  %p1690_p5 = scmp.lt.s32.totalorder %s1688_s23, %s1682_s25 }
  0x85   : > { %1369 = vmatprep.subr.bf16.mxu0 %v1564_v2  ;;  %v277_v11 = vadd.f32 %v276_v10, %v274_v7  ;;  %p1685_p9 = pneg %p1684_p7 }
  0x86   : > { %p1691_p2 = por %p1690_p5, %p1689_p11 }
  0x87   : > { %v278_v13 = vrot.slane %v277_v11, 4 }
  0x88   : > { %1370 = vmatpush3.bf16.msra.mxu0 %v1564_v2  ;;  %p1692_p4 = pnand %p1691_p2, %p1685_p9 }
  0x89   : > { %1371 = vmatprep.subr.bf16.mxu0 %v1565_v3  ;;  %v279_v14 = vadd.f32 %v278_v13, %v277_v11 }
  0x8b   : > { %v280_v15 = vrot.slane %v279_v14, 2 }
  0x8c   : > { %1372 = vmatpush3.bf16.msra.mxu0 %v1565_v3 }
  0x8d   : > { %1373 = vmatprep.subr.bf16.mxu0 %v1566_v9  ;;  %v281_v17 = vadd.f32 %v280_v15, %v279_v14 }
  0x8f   : > { %v282_v18 = vrot.slane %v281_v17, 1 }
  0x90   : > { %1374 = vmatpush3.bf16.msra.mxu0 %v1566_v9 }
  0x91   : > { %1375 = vmatprep.subr.bf16.mxu0 %v1567_v12  ;;  %v283_v20 = vadd.f32 %v282_v18, %v281_v17 }
  0x93   : > { %v285_v21 = vmul.f32 0.03125, %v283_v20 }
  0x94   : > { %1376 = vmatpush3.bf16.msra.mxu0 %v1567_v12 }
  0x95   : > { %1377 = vmatprep.subr.bf16.mxu0 %v1568_v16  ;;  %v286_v22 = vsub.f32 %v271_v4, %v285_v21  ;;  %v287_v23 = vsub.f32 %v272_v5, %v285_v21  ;;  %v288_v24 = vsub.f32 %v273_v6, %v285_v21  ;;  %v289_v25 = vsub.f32 %v274_v7, %v285_v21  ;;  %v1570_v21 = vld [vmem:[#allocation7 + $0x40] sm:$0xff]  }
  0x97   : > { %v290_v26 = vmul.f32 %v286_v22, %v286_v22  ;;  %v291_v27 = vmul.f32 %v287_v23, %v287_v23  ;;  %v292_v28 = vmul.f32 %v288_v24, %v288_v24  ;;  %v293_v29 = vmul.f32 %v289_v25, %v289_v25 }
  0x98   : > { %1378 = vmatpush3.bf16.msra.mxu0 %v1568_v16 }
  0x99   : > { %1379 = vmatprep.subr.bf16.mxu0 %v1569_v19  ;;  %v294_v30 = vadd.f32 %v291_v27, %v290_v26  ;;  %v1575_v26 = vld [vmem:[#allocation7 + $0x68] sm:$0xff]   ;;  %v1576_v27 = vld [vmem:[#allocation7 + $0x70] sm:$0xff]  }
  0x9b   : > { %v295_v31 = vadd.f32 %v294_v30, %v292_v28  ;;  %v1577_v28 = vld [vmem:[#allocation7 + $0x78] sm:$0xff]  }
  0x9c   : > { %1380 = vmatpush3.bf16.msra.mxu0 %v1569_v19 }
  0x9d   : > { %v296_v32 = vadd.f32 %v295_v31, %v293_v29 }
  0x9f   : > { %v297_v33 = vrot.slane %v296_v32, 4 }
  0xa1   : > { %v298_v34 = vadd.f32 %v297_v33, %v296_v32 }
  0xa3   : > { %v299_v35 = vrot.slane %v298_v34, 2 }
  0xa5   : > { %v300_v36 = vadd.f32 %v299_v35, %v298_v34 }
  0xa7   : > { %v301_v37 = vrot.slane %v300_v36, 1 }
  0xa9   : > { %v302_v38 = vadd.f32 %v301_v37, %v300_v36 }
  0xab   : > { %v303_v39 = vmul.f32 0.03125, %v302_v38 }
  0xad   : > { %v304_v40 = vadd.f32 1e-05, %v303_v39 }
  0xaf   : > { %1586 = vrsqrt.f32 %v304_v40 }
  0xb9   : > { %v1587_v41 = vpop.eup %1586 }
  0xba   : > { %v306_v42 = vmul.f32 %v1587_v41, %v286_v22  ;;  %v307_v43 = vmul.f32 %v1587_v41, %v287_v23  ;;  %v308_v44 = vmul.f32 %v1587_v41, %v288_v24  ;;  %v309_v45 = vmul.f32 %v1587_v41, %v289_v25  ;;  %v1571_v22 = vld [vmem:[#allocation7 + $0x48] sm:$0xff]   ;;  %v1572_v23 = vld [vmem:[#allocation7 + $0x50] sm:$0xff]   ;;  %v1573_v24 = vld [vmem:[#allocation7 + $0x58] sm:$0xff]  }
  0xbb   : > { %v1574_v25 = vld [vmem:[#allocation7 + $0x60] sm:$0xff]  }
  0xbc   : > { %v331_v46 = vpack.c.bf16 %v307_v43, %v306_v42  ;;  %v332_v47 = vpack.c.bf16 %v309_v45, %v308_v44 }
  0xbe   : > { %1381 = vmatprep.mubr.bf16.mxu0 %v331_v46 }
  0xbf   : > { %1382 = vmatmul.mubr.bf16.vlgmr.msra.gmra.mrb[0].mxu0 %v332_v47 }
 0x192   : > { %v1383_v49 = vpop.f32.mrb[0].mxu0 }
 0x193   : > { %v415_v50 = vpop.f32.mrb[1].mxu0 }
 0x194   : > { %v1384_v51 = vpop.f32.mrb[2].mxu0 }
 0x195   : > { %v1471_v52 = vpack.c.bf16 %v1384_v51, %v1383_v49  ;;  %v418_v53 = vpop.f32.mrb[3].mxu0 }
 0x196   : > { %v1467_v54 = vpack.c.bf16 %v418_v53, %v415_v50 }
 0x198   : > { %1468 = vmatprep.subr.bf16.mxu1 %v1467_v54 }
 0x199   : > { %1470 = vmatpush3.bf16.msra.mxu1 %v1467_v54 }
 0x19a   : > { %1472 = vmatprep.subr.bf16.mxu1 %v1471_v52 }
 0x19d   : > { %1474 = vmatpush3.bf16.msra.mxu1 %v1471_v52 }
 0x19e   : > { %1399 = vmatprep.subr.bf16.mxu1 %v1570_v21 }
 0x1a0   : > { %1394 = vmatmul.mubr.msk.f32.vlgmr.msra.gmra.mrb[0].mxu1 %vm436_vm0, %v311_v55  ;;  %v1268_v55 = vld [vmem:[%s1981_s12 + $0x20] sm:$0xff] }
 0x1a1   : > { %1396 = vmatprep.mubr.msk.f32.mxu1 %vm436_vm0, %v312_v56  ;;  %1400 = vmatpush3.bf16.msra.mxu1 %v1570_v21 }
 0x1a2   : > { %1401 = vmatprep.subr.bf16.mxu1 %v1571_v22 }
 0x1a4   : > { %1397 = vmatmul.mubr.msk.f32.gmra.mrb[2].mxu1 %vm436_vm0, %v313_v57 }
 0x1a5   : > { %1402 = vmatpush3.bf16.msra.mxu1 %v1571_v22 }
 0x1a6   : > { %1403 = vmatprep.subr.bf16.mxu1 %v1572_v23 }
 0x1a9   : > { %1404 = vmatpush3.bf16.msra.mxu1 %v1572_v23 }
 0x1aa   : > { %1405 = vmatprep.subr.bf16.mxu1 %v1573_v24 }
 0x1ad   : > { %1406 = vmatpush3.bf16.msra.mxu1 %v1573_v24 }
 0x1ae   : > { %1407 = vmatprep.subr.bf16.mxu1 %v1574_v25 }
 0x1b1   : > { %1408 = vmatpush3.bf16.msra.mxu1 %v1574_v25 }
 0x1b2   : > { %1409 = vmatprep.subr.bf16.mxu1 %v1575_v26 }
 0x1b5   : > { %1410 = vmatpush3.bf16.msra.mxu1 %v1575_v26 }
 0x1b6   : > { %1411 = vmatprep.subr.bf16.mxu1 %v1576_v27 }
 0x1b9   : > { %1412 = vmatpush3.bf16.msra.mxu1 %v1576_v27 }
 0x1ba   : > { %1413 = vmatprep.subr.bf16.mxu1 %v1577_v28 }
 0x1bd   : > { %1414 = vmatpush3.bf16.msra.mxu1 %v1577_v28  ;;  %v1578_v28 = vld [vmem:[#allocation7 + $0x80] sm:$0xff]  }
 0x1be   : > { %1433 = vmatprep.subr.bf16.mxu0 %v1578_v28 }
 0x1bf   : > { %1434 = vmatpush3.bf16.msra.mxu0 %v1578_v28 }
 0x273   : > { %v1395_v59 = vpop.f32.mrb[0].mxu1 }
 0x274   : > { %v521_v60 = vadd.f32 %v1395_v59, %v1263_v58  ;;  %v515_v61 = vpop.f32.mrb[1].mxu1 }
 0x275   : > { %v516_v62 = vadd.f32 %v1263_v58, %v515_v61 }
 0x277   : > { %v534_v63 = vadd.f32 %v521_v60, %v516_v62  ;;  %v1398_v0 = vpop.f32.mrb[2].mxu1 }
 0x278   : > { %v525_v1 = vpop.f32.mrb[3].mxu1  ;;  %v531_v3 = vadd.f32 %v1398_v0, %v1263_v58  ;;  %v1271_v0 = vld [vmem:[%s1981_s12 + $0x38] sm:$0xff] }
 0x279   : > { %v526_v2 = vadd.f32 %v1263_v58, %v525_v1  ;;  %v1281_v1 = vld [vmem:[%s2078_s3 + $0x1] ss:$0 sm:$0xff] }
 0x27b   : > { %v535_v4 = vadd.f32 %v534_v63, %v526_v2  ;;  %v1270_v63 = vld [vmem:[%s1981_s12 + $0x30] sm:$0xff] }
 0x27d   : > { %v536_v5 = vadd.f32 %v535_v4, %v531_v3 }
 0x27f   : > { %v537_v6 = vrot.slane %v536_v5, 4 }
 0x281   : > { %v538_v7 = vadd.f32 %v537_v6, %v536_v5 }
 0x283   : > { %v539_v8 = vrot.slane %v538_v7, 2 }
 0x285   : > { %v540_v9 = vadd.f32 %v539_v8, %v538_v7 }
 0x287   : > { %v541_v10 = vrot.slane %v540_v9, 1 }
 0x289   : > { %v542_v11 = vadd.f32 %v541_v10, %v540_v9 }
 0x28b   : > { %v543_v12 = vmul.f32 0.03125, %v542_v11 }
 0x28d   : > { %v546_v13 = vsub.f32 %v526_v2, %v543_v12  ;;  %v544_v14 = vsub.f32 %v516_v62, %v543_v12  ;;  %v547_v15 = vsub.f32 %v531_v3, %v543_v12  ;;  %v545_v16 = vsub.f32 %v521_v60, %v543_v12  ;;  %v1269_v62 = vld [vmem:[%s1981_s12 + $0x28] sm:$0xff] }
 0x28f   : > { %v550_v17 = vmul.f32 %v546_v13, %v546_v13  ;;  %v548_v18 = vmul.f32 %v544_v14, %v544_v14  ;;  %v551_v19 = vmul.f32 %v547_v15, %v547_v15  ;;  %v549_v20 = vmul.f32 %v545_v16, %v545_v16 }
 0x291   : > { %556 = vadd.xlane.f32.xlu1 %v550_v17  ;;  %552 = vadd.xlane.f32.xlu0 %v548_v18 }
 0x295   : > { %558 = vadd.xlane.f32.xlu1 %v551_v19  ;;  %554 = vadd.xlane.f32.xlu0 %v549_v20 }
 0x31e   : > { %v553_v29 = vpop.xlane.xlu0 %552  ;;  %v557_v30 = vpop.xlane.xlu1 %556 }
 0x322   : > { %v555_v31 = vpop.xlane.xlu0 %554  ;;  %v559_v34 = vpop.xlane.xlu1 %558 }
 0x323   : > { %v560_v32 = vadd.f32 %v555_v31, %v553_v29  ;;  %v1579_v29 = vld [vmem:[#allocation7 + $0x88] sm:$0xff]   ;;  %v1581_v31 = vld [vmem:[#allocation7 + $0x98] sm:$0xff]  }
 0x324   : > { %1435 = vmatprep.subr.bf16.mxu0 %v1579_v29 }
 0x325   : > { %v561_v33 = vadd.f32 %v560_v32, %v557_v30  ;;  %1436 = vmatpush3.bf16.msra.mxu0 %v1579_v29  ;;  %v1580_v30 = vld [vmem:[#allocation7 + $0x90] sm:$0xff]   ;;  %v1582_v32 = vld [vmem:[#allocation7 + $0xa0] sm:$0xff]  }
 0x326   : > { %1437 = vmatprep.subr.bf16.mxu0 %v1580_v30 }
 0x327   : > { %v562_v35 = vadd.f32 %v561_v33, %v559_v34  ;;  %v1583_v33 = vld [vmem:[#allocation7 + $0xa8] sm:$0xff]   ;;  %v1584_v34 = vld [vmem:[#allocation7 + $0xb0] sm:$0xff]  }
 0x329   : > { %v563_v36 = vrot.slane %v562_v35, 4  ;;  %1438 = vmatpush3.bf16.msra.mxu0 %v1580_v30 }
 0x32a   : > { %1439 = vmatprep.subr.bf16.mxu0 %v1581_v31 }
 0x32b   : > { %v564_v37 = vadd.f32 %v563_v36, %v562_v35  ;;  %v1585_v35 = vld [vmem:[#allocation7 + $0xb8] sm:$0xff]  }
 0x32d   : > { %v565_v38 = vrot.slane %v564_v37, 2  ;;  %1440 = vmatpush3.bf16.msra.mxu0 %v1581_v31 }
 0x32e   : > { %1441 = vmatprep.subr.bf16.mxu0 %v1582_v32 }
 0x32f   : > { %v566_v39 = vadd.f32 %v565_v38, %v564_v37 }
 0x331   : > { %v567_v40 = vrot.slane %v566_v39, 1  ;;  %1442 = vmatpush3.bf16.msra.mxu0 %v1582_v32 }
 0x332   : > { %1443 = vmatprep.subr.bf16.mxu0 %v1583_v33 }
 0x333   : > { %v568_v41 = vadd.f32 %v567_v40, %v566_v39 }
 0x335   : > { %v569_v42 = vmul.f32 0.03125, %v568_v41  ;;  %1444 = vmatpush3.bf16.msra.mxu0 %v1583_v33 }
 0x336   : > { %1445 = vmatprep.subr.bf16.mxu0 %v1584_v34 }
 0x337   : > { %v570_v43 = vadd.f32 1e-06, %v569_v42 }
 0x339   : > { %1588 = vrsqrt.f32 %v570_v43  ;;  %1446 = vmatpush3.bf16.msra.mxu0 %v1584_v34 }
 0x33a   : > { %1447 = vmatprep.subr.bf16.mxu0 %v1585_v35 }
 0x33d   : > { %1448 = vmatpush3.bf16.msra.mxu0 %v1585_v35 }
 0x343   : > { %v1589_v44 = vpop.eup %1588 }
 0x344   : > { %v572_v45 = vmul.f32 %v1589_v44, %v544_v14  ;;  %v573_v46 = vmul.f32 %v1589_v44, %v545_v16  ;;  %v574_v47 = vmul.f32 %v1589_v44, %v546_v13  ;;  %v575_v48 = vmul.f32 %v1589_v44, %v547_v15 }
 0x346   : > { %v576_v49 = vmax.f32 %v572_v45, 0.0  ;;  %v577_v50 = vmax.f32 %v573_v46, 0.0  ;;  %v578_v51 = vmax.f32 %v574_v47, 0.0  ;;  %v579_v52 = vmax.f32 %v575_v48, 0.0 }
 0x348   : > { %v604_v53 = vpack.c.bf16 %v577_v50, %v576_v49  ;;  %v605_v54 = vpack.c.bf16 %v579_v52, %v578_v51 }
 0x34a   : > { %1415 = vmatprep.mubr.bf16.mxu1 %v604_v53 }
 0x34b   : > { %1416 = vmatmul.mubr.bf16.vlgmr.msra.gmra.mrb[4].mxu1 %v605_v54 }
 0x34c   : > { %1427 = vmatprep.mubr.msk.f32.mxu1 %vm436_vm0, %v1268_v55 }
 0x41e   : > { %v1417_v56 = vpop.f32.mrb[4].mxu1 }
 0x41f   : > { %v688_v57 = vpop.f32.mrb[5].mxu1 }
 0x420   : > { %v1418_v58 = vpop.f32.mrb[6].mxu1 }
 0x421   : > { %v1479_v59 = vpack.c.bf16 %v1418_v58, %v1417_v56  ;;  %v691_v60 = vpop.f32.mrb[7].mxu1 }
 0x422   : > { %v1475_v61 = vpack.c.bf16 %v691_v60, %v688_v57 }
 0x424   : > { %1476 = vmatprep.subr.bf16.mxu1 %v1475_v61 }
 0x425   : > { %1478 = vmatpush3.bf16.msra.mxu1 %v1475_v61 }
 0x426   : > { %1480 = vmatprep.subr.bf16.mxu1 %v1479_v59 }
 0x429   : > { %1482 = vmatpush3.bf16.msra.mxu1 %v1479_v59 }
 0x42c   : > { %1428 = vmatmul.mubr.msk.f32.vlgmr.msra.gmra.mrb[8].mxu1 %vm436_vm0, %v1269_v62  ;;  %v1286_v62 = vld [vmem:[%s1981_s12 + $0x40] sm:$0xff] }
 0x42d   : > { %1430 = vmatprep.mubr.msk.f32.mxu1 %vm436_vm0, %v1270_v63 }
 0x430   : > { %1431 = vmatmul.mubr.msk.f32.gmra.mrb[10].mxu1 %vm436_vm0, %v1271_v0 }
 0x431   : > { %1461 = vmatprep.mubr.msk.f32.mxu1 %vm436_vm0, %v1286_v62 }
 0x4ff   : > { %v1429_v2 = vpop.f32.mrb[8].mxu1 }
 0x500   : > { %v793_v3 = vadd.f32 %v1429_v2, %v1281_v1  ;;  %v787_v4 = vpop.f32.mrb[9].mxu1 }
 0x501   : > { %v788_v5 = vadd.f32 %v1281_v1, %v787_v4 }
 0x503   : > { %v806_v6 = vadd.f32 %v793_v3, %v788_v5  ;;  %v1432_v7 = vpop.f32.mrb[10].mxu1 }
 0x504   : > { %v797_v8 = vpop.f32.mrb[11].mxu1  ;;  %v803_v10 = vadd.f32 %v1432_v7, %v1281_v1  ;;  %v1289_v7 = vld [vmem:[%s1981_s12 + $0x58] sm:$0xff] }
 0x505   : > { %v798_v9 = vadd.f32 %v1281_v1, %v797_v8  ;;  %v1299_v8 = vld [vmem:[%s2078_s3 + $0x2] ss:$0 sm:$0xff] }
 0x507   : > { %v807_v11 = vadd.f32 %v806_v6, %v798_v9  ;;  %v1288_v6 = vld [vmem:[%s1981_s12 + $0x50] sm:$0xff] }
 0x509   : > { %v808_v12 = vadd.f32 %v807_v11, %v803_v10 }
 0x50b   : > { %v809_v13 = vrot.slane %v808_v12, 4 }
 0x50d   : > { %v810_v14 = vadd.f32 %v809_v13, %v808_v12 }
 0x50f   : > { %v811_v15 = vrot.slane %v810_v14, 2 }
 0x511   : > { %v812_v16 = vadd.f32 %v811_v15, %v810_v14 }
 0x513   : > { %v813_v17 = vrot.slane %v812_v16, 1 }
 0x515   : > { %v814_v18 = vadd.f32 %v813_v17, %v812_v16 }
 0x517   : > { %v815_v19 = vmul.f32 0.03125, %v814_v18 }
 0x519   : > { %v818_v20 = vsub.f32 %v798_v9, %v815_v19  ;;  %v817_v21 = vsub.f32 %v793_v3, %v815_v19  ;;  %v816_v22 = vsub.f32 %v788_v5, %v815_v19  ;;  %v819_v23 = vsub.f32 %v803_v10, %v815_v19  ;;  %v1287_v5 = vld [vmem:[%s1981_s12 + $0x48] sm:$0xff] }
 0x51b   : > { %v821_v24 = vmul.f32 %v817_v21, %v817_v21  ;;  %v820_v25 = vmul.f32 %v816_v22, %v816_v22  ;;  %v823_v26 = vmul.f32 %v819_v23, %v819_v23  ;;  %v822_v27 = vmul.f32 %v818_v20, %v818_v20 }
 0x51d   : > { %826 = vadd.xlane.f32.xlu1 %v821_v24  ;;  %824 = vadd.xlane.f32.xlu0 %v820_v25 }
 0x521   : > { %830 = vadd.xlane.f32.xlu1 %v823_v26  ;;  %828 = vadd.xlane.f32.xlu0 %v822_v27 }
 0x5aa   : > { %v827_v36 = vpop.xlane.xlu1 %826  ;;  %v825_v37 = vpop.xlane.xlu0 %824 }
 0x5ab   : > { %v832_v38 = vadd.f32 %v827_v36, %v825_v37 }
 0x5ae   : > { %v829_v39 = vpop.xlane.xlu0 %828  ;;  %v831_v41 = vpop.xlane.xlu1 %830 }
 0x5af   : > { %v833_v40 = vadd.f32 %v832_v38, %v829_v39 }
 0x5b1   : > { %v834_v42 = vadd.f32 %v833_v40, %v831_v41 }
 0x5b3   : > { %v835_v43 = vrot.slane %v834_v42, 4 }
 0x5b5   : > { %v836_v44 = vadd.f32 %v835_v43, %v834_v42 }
 0x5b7   : > { %v837_v45 = vrot.slane %v836_v44, 2 }
 0x5b9   : > { %v838_v46 = vadd.f32 %v837_v45, %v836_v44 }
 0x5bb   : > { %v839_v47 = vrot.slane %v838_v46, 1 }
 0x5bd   : > { %v840_v48 = vadd.f32 %v839_v47, %v838_v46 }
 0x5bf   : > { %v841_v49 = vmul.f32 0.03125, %v840_v48 }
 0x5c1   : > { %v842_v50 = vadd.f32 1e-06, %v841_v49 }
 0x5c3   : > { %1590 = vrsqrt.f32 %v842_v50 }
 0x5cd   : > { %v1591_v51 = vpop.eup %1590 }
 0x5ce   : > { %v844_v52 = vmul.f32 %v1591_v51, %v816_v22  ;;  %v845_v53 = vmul.f32 %v1591_v51, %v817_v21  ;;  %v846_v54 = vmul.f32 %v1591_v51, %v818_v20  ;;  %v847_v55 = vmul.f32 %v1591_v51, %v819_v23 }
 0x5d0   : > { %v848_v56 = vmax.f32 %v844_v52, 0.0  ;;  %v849_v57 = vmax.f32 %v845_v53, 0.0  ;;  %v850_v58 = vmax.f32 %v846_v54, 0.0  ;;  %v851_v59 = vmax.f32 %v847_v55, 0.0 }
 0x5d2   : > { %v876_v60 = vpack.c.bf16 %v849_v57, %v848_v56  ;;  %v877_v61 = vpack.c.bf16 %v851_v59, %v850_v58 }
 0x5d4   : > { %1449 = vmatprep.mubr.bf16.mxu0 %v876_v60 }
 0x5d5   : > { %1450 = vmatmul.mubr.bf16.vlgmr.msra.gmra.mrb[4].mxu0 %v877_v61 }
 0x6a8   : > { %v1451_v63 = vpop.f32.mrb[4].mxu0 }
 0x6a9   : > { %v960_v0 = vpop.f32.mrb[5].mxu0 }
 0x6aa   : > { %v1452_v1 = vpop.f32.mrb[6].mxu0 }
 0x6ab   : > { %v1487_v2 = vpack.c.bf16 %v1452_v1, %v1451_v63  ;;  %v963_v3 = vpop.f32.mrb[7].mxu0 }
 0x6ac   : > { %v1483_v4 = vpack.c.bf16 %v963_v3, %v960_v0 }
 0x6ae   : > { %1484 = vmatprep.subr.bf16.mxu1 %v1483_v4 }
 0x6af   : > { %1486 = vmatpush3.bf16.msra.mxu1 %v1483_v4 }
 0x6b0   : > { %1488 = vmatprep.subr.bf16.mxu1 %v1487_v2 }
 0x6b3   : > { %1490 = vmatpush3.bf16.msra.mxu1 %v1487_v2 }
 0x6b6   : > { %1462 = vmatmul.mubr.msk.f32.vlgmr.msra.gmra.mrb[12].mxu1 %vm436_vm0, %v1287_v5 }
 0x6b7   : > { %1464 = vmatprep.mubr.msk.f32.mxu1 %vm436_vm0, %v1288_v6 }
 0x6ba   : > { %1465 = vmatmul.mubr.msk.f32.gmra.mrb[14].mxu1 %vm436_vm0, %v1289_v7 }
 0x789   : > { %v1463_v9 = vpop.f32.mrb[12].mxu1 }
 0x78a   : > { %v1065_v10 = vadd.f32 %v1463_v9, %v1299_v8  ;;  %v1059_v11 = vpop.f32.mrb[13].mxu1 }
 0x78b   : > { %v1060_v12 = vadd.f32 %v1299_v8, %v1059_v11 }
 0x78d   : > { %v1078_v13 = vadd.f32 %v1065_v10, %v1060_v12  ;;  %v1466_v14 = vpop.f32.mrb[14].mxu1 }
 0x78e   : > { %v1069_v15 = vpop.f32.mrb[15].mxu1  ;;  %v1075_v17 = vadd.f32 %v1466_v14, %v1299_v8 }
 0x78f   : > { %v1070_v16 = vadd.f32 %v1299_v8, %v1069_v15 }
 0x791   : > { %v1079_v18 = vadd.f32 %v1078_v13, %v1070_v16 }
 0x793   : > { %v1080_v19 = vadd.f32 %v1079_v18, %v1075_v17 }
 0x795   : > { %v1081_v20 = vrot.slane %v1080_v19, 4 }
 0x797   : > { %v1082_v21 = vadd.f32 %v1081_v20, %v1080_v19 }
 0x799   : > { %v1083_v22 = vrot.slane %v1082_v21, 2 }
 0x79b   : > { %v1084_v23 = vadd.f32 %v1083_v22, %v1082_v21 }
 0x79d   : > { %v1085_v24 = vrot.slane %v1084_v23, 1 }
 0x79f   : > { %v1086_v25 = vadd.f32 %v1085_v24, %v1084_v23 }
 0x7a1   : > { %v1087_v26 = vmul.f32 0.03125, %v1086_v25 }
 0x7a3   : > { %v1090_v27 = vsub.f32 %v1070_v16, %v1087_v26  ;;  %v1089_v28 = vsub.f32 %v1065_v10, %v1087_v26  ;;  %v1088_v29 = vsub.f32 %v1060_v12, %v1087_v26  ;;  %v1091_v30 = vsub.f32 %v1075_v17, %v1087_v26 }
 0x7a5   : > { %v1093_v31 = vmul.f32 %v1089_v28, %v1089_v28  ;;  %v1092_v32 = vmul.f32 %v1088_v29, %v1088_v29  ;;  %v1095_v33 = vmul.f32 %v1091_v30, %v1091_v30  ;;  %v1094_v34 = vmul.f32 %v1090_v27, %v1090_v27 }
 0x7a7   : > { %1098 = vadd.xlane.f32.xlu1 %v1093_v31  ;;  %1096 = vadd.xlane.f32.xlu0 %v1092_v32 }
 0x7ab   : > { %1102 = vadd.xlane.f32.xlu1 %v1095_v33  ;;  %1100 = vadd.xlane.f32.xlu0 %v1094_v34 }
 0x834   : > { %v1099_v35 = vpop.xlane.xlu1 %1098  ;;  %v1097_v36 = vpop.xlane.xlu0 %1096 }
 0x835   : > { %v1104_v37 = vadd.f32 %v1099_v35, %v1097_v36 }
 0x838   : > { %v1101_v38 = vpop.xlane.xlu0 %1100  ;;  %v1103_v40 = vpop.xlane.xlu1 %1102 }
 0x839   : > { %v1105_v39 = vadd.f32 %v1104_v37, %v1101_v38 }
 0x83b   : > { %v1106_v41 = vadd.f32 %v1105_v39, %v1103_v40 }
 0x83d   : > { %v1107_v42 = vrot.slane %v1106_v41, 4 }
 0x83f   : > { %v1108_v43 = vadd.f32 %v1107_v42, %v1106_v41 }
 0x841   : > { %v1109_v44 = vrot.slane %v1108_v43, 2 }
 0x843   : > { %v1110_v45 = vadd.f32 %v1109_v44, %v1108_v43 }
 0x845   : > { %v1111_v46 = vrot.slane %v1110_v45, 1 }
 0x847   : > { %v1112_v47 = vadd.f32 %v1111_v46, %v1110_v45 }
 0x849   : > { %v1113_v48 = vmul.f32 0.03125, %v1112_v47 }
 0x84b   : > { %v1114_v49 = vadd.f32 1e-06, %v1113_v48 }
 0x84d   : > { %1592 = vrsqrt.f32 %v1114_v49 }
 0x857   : > { %v1593_v50 = vpop.eup %1592 }
 0x858   : > { %v1116_v51 = vmul.f32 %v1593_v50, %v1088_v29  ;;  %v1117_v52 = vmul.f32 %v1593_v50, %v1089_v28  ;;  %v1118_v53 = vmul.f32 %v1593_v50, %v1090_v27  ;;  %v1119_v54 = vmul.f32 %v1593_v50, %v1091_v30 }
 0x85a   : > { %1120 = vst [vmem:[%s269_s13] sm:$0xff] %v1116_v51  ;;  %1121 = vst [vmem:[%s269_s13 + $0x8] sm:$0xff] %v1117_v52 }
 0x85b   : > { %1122 = vst [vmem:[%s269_s13 + $0x10] sm:$0xff] %v1118_v53  ;;  %1123 = vst [vmem:[%s269_s13 + $0x18] sm:$0xff] %v1119_v54 }
 0x85c   : > { %1695 = shalt.err (!%p1692_p4)
}
 0x85d   : > { %s1696_s11 = scalar_lea.hbm %s2030_s5, 512  ;;  %s1700_s7 = scalar_lea.hbm %s2079_s4, 4096 }
 0x85e   : > { %p1697_p6 = scmp.ne.s32.totalorder %s2030_s5, %s1696_s11  ;;  %p1701_p1 = scmp.lt.u32.totalorder %s2030_s5, %s2079_s4 }
 0x85f   : > { %p1702_p10 = scmp.lt.u32.totalorder %s1700_s7, %s1696_s11  ;;  %p1704_p3 = scmp.lt.u32.totalorder %s1696_s11, %s2030_s5 }
 0x860   : > { %p1698_p8 = pnand %p1697_p6, %p1876_p12 }
 0x861   : > { %p1703_p13 = por %p1702_p10, %p1701_p1 }
 0x862   : > { %p1699_p0 = pneg %p1698_p8 }
 0x863   : > { %p1705_p7 = por %p1704_p3, %p1703_p13 }
 0x865   : > { %p1706_p9 = pnand %p1705_p7, %p1699_p0 }
 0x867   : > { %1709 = shalt.err (!%p1706_p9)
}
 0x868   : > { %s1766_s8 = smov 128   ;;  %s1767_s10 = smov 8  }
 0x869   : > { %1502 = dma.vmem_to_hbm [thread:$0]  (%p1876_p12), %s2032_s14, 512, %s2030_s5, %s1125_s19, %s1766_s8, %s1766_s8, %s1767_s10  }
 0x86a PF: > { %p1522_p11 = scmp.ge.s32.totalorder %s1756_s18, 2  ;;  %s1153_s20 = sand.u32 1, %s1744_s15  }
 0x86b   : > { %p2098_p5 = scmp.ne.s32.totalorder %s2086_s22, 0  ;;  %s1154_s13 = scalar_lea.sflag [#allocation4], %s1153_s20 }
 0x86d   : > { %p1516_p2 = pnand %p1522_p11, %p2098_p5 }
 0x86f   : > { %1739 = dma.done.wait (!%p1516_p2), %s1154_s13, 512  }
 0x870   : > { %1741 = vsyncadd (!%p1516_p2), %s1154_s13, 4294966784  ;;  %p20_p4 = scmp.ge.s32.totalorder %s1846_s27, 10   ;;  %s2099_s15 = smov %s1748_s16 }
 0x871   : > { %s2100_s16 = smov %s1752_s17  ;;  %s2101_s17 = smov %s1872_s24 }
 0x872   : > { %s2102_s18 = smov %s1846_s27  ;;  %22 = sbr.rel (!%p20_p4) target bundleno = 10 (0xa), region = 104 }
 0x879   :  { %1159 = vsyncpa [#allocation3], 1 }
 0x87a   :  { %1161 = vsyncpa [#allocation3 + $0x1], 1 }
 0x87b   :  { %1162 = vsyncpa [#allocation6], 1 }
 0x87c   :  { %1164 = vsyncpa [#allocation6 + $0x1], 1 }
 0x87d   :  { %1165 = vsyncpa [#allocation4], 1 }
 0x87e   :  { %1167 = vsyncpa [#allocation4 + $0x1], 1 }

</bundles_post_ra>
